<compile_context>
chip_gen: v7x
topology: tpu7x:2x2x1
jax: 0.10.0
libtpu: 0.0.40
codegen_flags: <defaults>
</compile_context>

<pallas_src>
import math
from functools import partial

import jax
import jax.numpy as jnp
from jax.experimental import pallas as pl
from jax.experimental.pallas import tpu as pltpu


_F32_TMP_BYTES_PER_ELEM = 16      # in-kernel f32 temporaries (x cast, masked x, exp, transients)
_TRAFFIC_TARGET_BYTES = 12 << 20  # ~12 MiB of HBM traffic per grid step (roofline-saturating)


# --------------------------------------------------------------------------- #
# Small helpers
# --------------------------------------------------------------------------- #
def _round_up(n: int, m: int) -> int:
    return ((n + m - 1) // m) * m


def _round_down(n: int, m: int) -> int:
    return (n // m) * m


def _physical_vmem_bytes() -> int:
    try:
        info = pltpu.get_tpu_info()
        v = getattr(info, "vmem_capacity_bytes", None)
        if v:
            return int(v)
    except Exception:
        pass
    return 64 * 1024 * 1024  # conservative fallback: v7x per-TensorCore VMEM


def _vmem_budget(phys: int) -> int:
    # Double-buffered pipeline blocks + in-kernel f32 temporaries must fit here:
    # ~38 MiB on v7x (64 MiB/TC), ~77 MiB on v5e / v6e (128 MiB).
    return min(int(phys * 0.6), 80 << 20)


def _vmem_limit_bytes(x_block_elems: int, m_block_elems: int,
                      x_bytes: int, m_bytes: int, phys: int) -> int:
    # x + out double-buffered pipeline blocks + mask blocks + f32 body temps,
    # plus 8 MiB headroom; at least 32 MiB (v5e's scoped default is only 16 MiB).
    pipe = 2 * (x_block_elems * 2 * x_bytes + m_block_elems * m_bytes)
    tmp = x_block_elems * _F32_TMP_BYTES_PER_ELEM
    return int(min(int(phys * 0.9), max(pipe + tmp + (8 << 20), 32 << 20)))


def _choose_outer_tile(n: int, slice_elems: int, pipe_bpe: int, traffic_bpe: int,
                       phys: int, *, align: int = 1) -> int:
    """Tile size along the outer (non-softmax) block dim.

    slice_elems : elements per unit of the outer dim (full softmax axis x lane block)
    pipe_bpe    : double-buffered pipeline bytes / element (x + mask + out)
    traffic_bpe : single-pass HBM bytes / element
    align       : 8 when this dim is the sublane dim (2-D path), 1 for a leading dim
    """
    if n <= align:
        return max(n, 1)
    per_slice_vmem = slice_elems * (pipe_bpe + _F32_TMP_BYTES_PER_ELEM)
    per_slice_traffic = max(slice_elems * traffic_bpe, 1)
    cap = max(_vmem_budget(phys) // max(per_slice_vmem, 1), 1)    # hard VMEM cap
    target = max(_TRAFFIC_TARGET_BYTES // per_slice_traffic, 1)   # soft roofline target
    tile = min(target, cap, n)
    # Guarantee >= 2 grid steps so ("parallel", ...) can shard across both v7x
    # TensorCores (harmless on single-TC v5e / v6e).
    tile = min(tile, _round_up(pl.cdiv(n, 2), align))
    if tile < n and align > 1:
        tile = max(_round_down(tile, align), align)
        if tile >= 32:
            tile = _round_down(tile, 32)  # (32,128)-tile friendly for int8/bool masks
    return max(tile, 1)


# --------------------------------------------------------------------------- #
# Kernel
# --------------------------------------------------------------------------- #
def _mask_softmax_kernel(x_ref, m_ref, o_ref, *, axis):
    """One block; the full softmax axis is resident (lanes if axis=-1, sublanes
    if axis=-2).  Matches the PyTorch MaskSoftmax within float rounding."""
    xf = x_ref[...].astype(jnp.float32)
    m = m_ref[...]
    if m.shape != xf.shape:
        # Row-broadcast mask block (e.g. key-padding [1, D]): broadcast in a
        # numeric dtype (cheap sublane broadcast), then compare.
        mask_b = jnp.broadcast_to(m.astype(jnp.float32), xf.shape) != 0.0
    else:
        mask_b = m if m.dtype == jnp.bool_ else (m != 0)

    neg_inf = jnp.float32(-jnp.inf)
    # `xw` is the only full-tile f32 temp carried across the max reduction; it is
    # reused as the exp argument (masked lanes are -inf -> exp gives exactly 0).
    xw = jnp.where(mask_b, xf, neg_inf)
    max_x = jnp.max(xw, axis=axis, keepdims=True)
    max_x = jnp.where(jnp.isinf(max_x), jnp.float32(0.0), max_x)  # fully-masked groups

    p = jnp.exp(xw - max_x)
    denom = jnp.maximum(jnp.sum(p, axis=axis, keepdims=True), jnp.float32(1.0))

    # EUP approx reciprocal + one Newton step on the small keepdims column:
    # within ~1 ulp of an exact divide, and off the VALU.
    inv = pl.reciprocal(denom, approx=True)
    inv = inv * (jnp.float32(2.0) - denom * inv)

    o_ref[...] = (p * inv).astype(o_ref.dtype)


# --------------------------------------------------------------------------- #
# pallas_call drivers
# --------------------------------------------------------------------------- #
def _run(call, x, m):
    if m.dtype != jnp.bool_:
        return call(x, m)
    try:
        return call(x, m)
    except Exception:
        # TODO(synk): drop once bool VMEM refs are supported on every toolchain;
        # the cast costs one extra HBM pass over the mask.
        return call(x, m.astype(jnp.int8))


def _call_2d(x2, m2, row_bcast, phys):
    """Softmax over the last (lane) axis of a (R, D) view."""
    R, D = x2.shape
    x_b = x2.dtype.itemsize
    m_b = m2.dtype.itemsize
    m_eff = 0 if row_bcast else m_b
    tile_r = _choose_outer_tile(R, D, 2 * (2 * x_b + m_eff), 2 * x_b + m_eff,
                                phys, align=8)
    grid = (pl.cdiv(R, tile_r),)  # ragged last block: OOB rows are independent
    # garbage rows that are never stored back.

    x_spec = pl.BlockSpec((tile_r, D), lambda i: (i, 0))
    if row_bcast:
        m_spec = pl.BlockSpec((1, D), lambda i: (0, 0))
        m_elems = D
    else:
        m_spec = pl.BlockSpec((tile_r, D), lambda i: (i, 0))
        m_elems = tile_r * D

    call = pl.pallas_call(
        partial(_mask_softmax_kernel, axis=-1),
        out_shape=jax.ShapeDtypeStruct((R, D), x2.dtype),
        grid=grid,
        in_specs=[x_spec, m_spec],
        out_specs=pl.BlockSpec((tile_r, D), lambda i: (i, 0)),
        compiler_params=pltpu.CompilerParams(
            dimension_semantics=("parallel",),
            vmem_limit_bytes=_vmem_limit_bytes(tile_r * D, m_elems, x_b, m_b, phys),
        ),
    )
    return _run(call, x2, m2)


def _call_3d(x3, m3, row_bcast, phys):
    """Softmax over the middle (sublane) axis of a (L, D, T) view."""
    L, D, T = x3.shape
    x_b = x3.dtype.itemsize
    m_b = m3.dtype.itemsize
    m_eff = 0 if row_bcast else m_b
    pipe_bpe = 2 * (2 * x_b + m_eff)
    traffic_bpe = 2 * x_b + m_eff

    # Lane block over the trailing dims (lane-dense; ragged tail handled by Pallas).
    if T <= 128:
        tc = T
    else:
        per_col = D * (pipe_bpe + _F32_TMP_BYTES_PER_ELEM)
        tc = min(2048, _round_down(max(_vmem_budget(phys) // per_col, 128), 128))
        tc = min(tc, T) if T % 128 == 0 else min(tc, _round_down(T, 128))

    tb = _choose_outer_tile(L, D * tc, pipe_bpe, traffic_bpe, phys, align=1)
    grid = (pl.cdiv(L, tb), pl.cdiv(T, tc))

    x_spec = pl.BlockSpec((tb, D, tc), lambda i, j: (i, 0, j))
    if row_bcast:
        m_spec = pl.BlockSpec((1, D, 1), lambda i, j: (0, 0, 0))
        m_elems = D
    else:
        m_spec = pl.BlockSpec((tb, D, tc), lambda i, j: (i, 0, j))
        m_elems = tb * D * tc

    call = pl.pallas_call(
        partial(_mask_softmax_kernel, axis=-2),
        out_shape=jax.ShapeDtypeStruct((L, D, T), x3.dtype),
        grid=grid,
        in_specs=[x_spec, m_spec],
        out_specs=pl.BlockSpec((tb, D, tc), lambda i, j: (i, 0, j)),
        compiler_params=pltpu.CompilerParams(
            dimension_semantics=("parallel", "parallel"),
            vmem_limit_bytes=_vmem_limit_bytes(tb * D * tc, m_elems, x_b, m_b, phys),
        ),
    )
    return _run(call, x3, m3)


# --------------------------------------------------------------------------- #
# Public wrapper
# --------------------------------------------------------------------------- #
def mask_softmax(x: jax.Array, mask: jax.Array, dim: int) -> jax.Array:
    """Masked softmax along `dim`; semantics match the PyTorch MaskSoftmax.

    NOTE: the result is produced in x.dtype (written straight from the kernel to
    avoid an extra HBM pass; PyTorch would promote bf16 inputs to float32).
    Values match the PyTorch module within float rounding (equivalent but
    re-ordered denominator algebra + approx reciprocal with one Newton step).
    """
    ndim = x.ndim
    dim = dim % ndim
    D = x.shape[dim]

    # Align mask rank the way torch broadcasting would (left-pad with 1s).
    if mask.ndim < ndim:
        mask = mask.reshape((1,) * (ndim - mask.ndim) + mask.shape)

    same_shape = mask.shape == x.shape
    row_bcast = (not same_shape
                 and mask.shape[dim] == D
                 and all(mask.shape[a] == 1 for a in range(ndim) if a != dim))
    if not same_shape and not row_bcast:
        # TODO(synk): partially-broadcast masks (e.g. [B,1,1,S]) could be re-read
        # through the BlockSpec index_map instead of materializing R*D in HBM.
        mask = jnp.broadcast_to(mask, x.shape)

    lead = math.prod(x.shape[:dim])
    trail = math.prod(x.shape[dim + 1:])
    phys = _physical_vmem_bytes()

    if trail == 1:
        # Softmax axis is (effectively) last: 2-D blocks, reduce over lanes.
        # (For small D the lane dim is sparse, but fixing that would require a
        # real transpose, i.e. extra HBM passes, on this memory layout.)
        m2 = mask.reshape(1, D) if row_bcast else mask.reshape(lead, D)
        out = _call_2d(x.reshape(lead, D), m2, row_bcast, phys)
        return out.reshape(x.shape)

    if trail >= 8:
        # Middle-axis softmax: keep the layout, put the softmax axis on sublanes
        # (reduce axis=-2) and the trailing dims on lanes -- no transpose needed.
        m3 = mask.reshape(1, D, 1) if row_bcast else mask.reshape(lead, D, trail)
        out = _call_3d(x.reshape(lead, D, trail), m3, row_bcast, phys)
        return out.reshape(x.shape)

    # Tiny trailing dims (<8): wrapper-side transpose fallback.
    # TODO(synk): fold this transpose into the index_map to drop the extra HBM
    # round trips; it only triggers for trailing products < 8.
    xt = jnp.moveaxis(x, dim, -1)
    mt = jnp.moveaxis(mask, dim, -1)
    m2 = mt.reshape(1, D) if row_bcast else mt.reshape(-1, D)
    out = _call_2d(xt.reshape(-1, D), m2, row_bcast, phys)
    return jnp.moveaxis(out.reshape(xt.shape), -1, dim)


# --------------------------------------------------------------------------- #
# Pure-JAX reference (mirrors the PyTorch formula; verification only)
# --------------------------------------------------------------------------- #
def _mask_softmax_ref(x, mask, dim):
    mask_b = mask != 0
    mf = mask_b.astype(jnp.float32)
    xf = x.astype(jnp.float32)
    num_masked = jnp.sum(1.0 - mf, axis=dim, keepdims=True)
    max_x = jnp.max(jnp.where(mask_b, xf, -jnp.inf), axis=dim, keepdims=True)
    max_x = jnp.where(jnp.isinf(max_x), 0.0, max_x)
    numerator = jnp.exp((xf - max_x) * mf)
    denom = jnp.maximum(jnp.sum(numerator, axis=dim, keepdims=True) - num_masked, 1.0)
    return numerator * mf / denom


if __name__ == "__main__":
    key = jax.random.PRNGKey(0)
    k1, k2, k3, k4, k5, k6, k7, k8 = jax.random.split(key, 8)

    # --- 1) attention-like: f32 x, full-shape bool mask, softmax over last dim,
    #        including a fully-masked row (clamp path). ------------------------
    B, H, S = 2, 4, 16
    x1 = jax.random.normal(k1, (B, H, S, S), dtype=jnp.float32)
    m1 = jax.random.uniform(k2, (B, H, S, S)) > 0.3
    m1 = m1.at[0, 0, 0, :].set(False)
    o1 = jax.block_until_ready(mask_softmax(x1, m1, dim=-1))
    r1 = _mask_softmax_ref(x1, m1, dim=-1)
    assert o1.shape == x1.shape and o1.dtype == x1.dtype
    err1 = jnp.max(jnp.abs(o1 - r1))
    assert err1 < 5e-5, f"test1 mismatch: {err1}"

    # --- 2) bf16 x, float mask, softmax over a MIDDLE dim (3-D sublane path). -
    x2 = jax.random.normal(k3, (2, 12, 4, 8), dtype=jnp.bfloat16)
    m2 = (jax.random.uniform(k4, (2, 12, 4, 8)) > 0.4).astype(jnp.float32)
    o2 = jax.block_until_ready(mask_softmax(x2, m2, dim=1))
    r2 = _mask_softmax_ref(x2, m2, dim=1)
    assert o2.shape == x2.shape and o2.dtype == x2.dtype
    err2 = jnp.max(jnp.abs(o2.astype(jnp.float32) - r2))
    assert err2 < 2e-2, f"test2 mismatch: {err2}"

    # --- 3) broadcast key-padding mask [1,1,1,S], passed UN-expanded. ---------
    m3 = jax.random.uniform(k5, (1, 1, 1, S)) > 0.2
    o3 = jax.block_until_ready(mask_softmax(x1, m3, dim=-1))
    r3 = _mask_softmax_ref(x1, jnp.broadcast_to(m3, x1.shape), dim=-1)
    err3 = jnp.max(jnp.abs(o3 - r3))
    assert err3 < 5e-5, f"test3 mismatch: {err3}"

    # --- 4) tiny trailing dim (<8) -> transpose fallback, integer mask. -------
    x4 = jax.random.normal(k6, (4, 8, 2), dtype=jnp.float32)
    m4 = (jax.random.uniform(k7, (4, 8, 2)) > 0.3).astype(jnp.int32)
    o4 = jax.block_until_ready(mask_softmax(x4, m4, dim=1))
    r4 = _mask_softmax_ref(x4, m4, dim=1)
    err4 = jnp.max(jnp.abs(o4 - r4))
    assert err4 < 5e-5, f"test4 mismatch: {err4}"

    print("KERNEL_OK")
</pallas_src>

<mosaic_0001>
module attributes {stable_mosaic.version = 11 : i64} {
  func.func @_mask_softmax_kernel(%arg0: i32, %arg1: memref<64x16xf32, #tpu.memory_space<vmem>>, %arg2: memref<64x16xi32, #tpu.memory_space<vmem>>, %arg3: memref<64x16xf32, #tpu.memory_space<vmem>>) attributes {dimension_semantics = [#tpu.dimension_semantics<parallel>], iteration_bounds = array<i64: 2>, scalar_prefetch = 0 : i64, scratch_operands = 0 : i64, tpu.core_type = #tpu.core_type<tc>, window_params = [{transform_indices = @transform_0, window_bounds = array<i64: 64, 16>}, {transform_indices = @transform_1, window_bounds = array<i64: 64, 16>}, {transform_indices = @transform_2, window_bounds = array<i64: 64, 16>}]} {
    %c0 = arith.constant 0 : index
    %c0_0 = arith.constant 0 : index
    %0 = vector.load %arg1[%c0, %c0_0] : memref<64x16xf32, #tpu.memory_space<vmem>>, vector<64x16xf32>
    %c0_1 = arith.constant 0 : index
    %c0_2 = arith.constant 0 : index
    %1 = vector.load %arg2[%c0_1, %c0_2] : memref<64x16xi32, #tpu.memory_space<vmem>>, vector<64x16xi32>
    %cst = arith.constant dense<0> : vector<64x16xi32>
    %2 = arith.cmpi ne, %1, %cst : vector<64x16xi32>
    %cst_3 = arith.constant 0xFF800000 : f32
    %3 = vector.broadcast %cst_3 : f32 to vector<64x16xf32>
    %4 = arith.select %2, %0, %3 : vector<64x16xi1>, vector<64x16xf32>
    %cst_4 = arith.constant dense<0xFF800000> : vector<64xf32>
    %5 = vector.multi_reduction <maximumf>, %4, %cst_4 [1] : vector<64x16xf32> to vector<64xf32>
    %6 = vector.shape_cast %5 : vector<64xf32> to vector<64x1xf32>
    %7 = math.absf %6 : vector<64x1xf32>
    %cst_5 = arith.constant 0x7F800000 : f32
    %8 = vector.broadcast %cst_5 : f32 to vector<64x1xf32>
    %9 = arith.cmpf oeq, %7, %8 : vector<64x1xf32>
    %cst_6 = arith.constant 0.000000e+00 : f32
    %10 = vector.broadcast %cst_6 : f32 to vector<64x1xf32>
    %11 = arith.select %9, %10, %6 : vector<64x1xi1>, vector<64x1xf32>
    %12 = vector.broadcast %11 : vector<64x1xf32> to vector<64x16xf32>
    %13 = arith.subf %4, %12 : vector<64x16xf32>
    %14 = math.exp %13 : vector<64x16xf32>
    %cst_7 = arith.constant dense<0.000000e+00> : vector<64xf32>
    %15 = vector.multi_reduction <add>, %14, %cst_7 [1] : vector<64x16xf32> to vector<64xf32>
    %16 = vector.shape_cast %15 : vector<64xf32> to vector<64x1xf32>
    %cst_8 = arith.constant 1.000000e+00 : f32
    %17 = vector.broadcast %cst_8 : f32 to vector<64x1xf32>
    %18 = arith.maximumf %16, %17 : vector<64x1xf32>
    %19 = tpu.reciprocal %18 {approx = true} : vector<64x1xf32> -> vector<64x1xf32>
    %20 = arith.mulf %18, %19 : vector<64x1xf32>
    %cst_9 = arith.constant 2.000000e+00 : f32
    %21 = vector.broadcast %cst_9 : f32 to vector<64x1xf32>
    %22 = arith.subf %21, %20 : vector<64x1xf32>
    %23 = arith.mulf %19, %22 : vector<64x1xf32>
    %24 = vector.broadcast %23 : vector<64x1xf32> to vector<64x16xf32>
    %25 = arith.mulf %14, %24 : vector<64x16xf32>
    %c0_10 = arith.constant 0 : index
    %c0_11 = arith.constant 0 : index
    %26 = vector.load %arg3[%c0_10, %c0_11] : memref<64x16xf32, #tpu.memory_space<vmem>>, vector<64x16xf32>
    tpu.vector_store %arg3[%c0_10, %c0_11], %25 {strides = array<i32>} : memref<64x16xf32, #tpu.memory_space<vmem>>, vector<64x16xf32>,
    return
  }
  func.func @transform_0(%arg0: i32) -> (i32, i32) {
    %c0_i32 = arith.constant 0 : i32
    %c0_i32_0 = arith.constant 0 : i32
    return %arg0, %c0_i32 : i32, i32
  }
  func.func @transform_1(%arg0: i32) -> (i32, i32) {
    %c0_i32 = arith.constant 0 : i32
    %c0_i32_0 = arith.constant 0 : i32
    return %arg0, %c0_i32 : i32, i32
  }
  func.func @transform_2(%arg0: i32) -> (i32, i32) {
    %c0_i32 = arith.constant 0 : i32
    %c0_i32_0 = arith.constant 0 : i32
    return %arg0, %c0_i32 : i32, i32
  }
}

module attributes {stable_mosaic.version = 11 : i64} {
  func.func @_mask_softmax_kernel(%arg0: i32, %arg1: memref<64x16xf32, #tpu.memory_space<vmem>>, %arg2: memref<64x16xi8, #tpu.memory_space<vmem>>, %arg3: memref<64x16xf32, #tpu.memory_space<vmem>>) attributes {dimension_semantics = [#tpu.dimension_semantics<parallel>], iteration_bounds = array<i64: 2>, scalar_prefetch = 0 : i64, scratch_operands = 0 : i64, tpu.core_type = #tpu.core_type<tc>, window_params = [{transform_indices = @transform_0, window_bounds = array<i64: 64, 16>}, {transform_indices = @transform_1, window_bounds = array<i64: 64, 16>}, {transform_indices = @transform_2, window_bounds = array<i64: 64, 16>}]} {
    %c0 = arith.constant 0 : index
    %c0_0 = arith.constant 0 : index
    %0 = vector.load %arg1[%c0, %c0_0] : memref<64x16xf32, #tpu.memory_space<vmem>>, vector<64x16xf32>
    %c0_1 = arith.constant 0 : index
    %c0_2 = arith.constant 0 : index
    %1 = vector.load %arg2[%c0_1, %c0_2] : memref<64x16xi8, #tpu.memory_space<vmem>>, vector<64x16xi8>
    %c0_i8 = arith.constant 0 : i8
    %2 = vector.broadcast %c0_i8 : i8 to vector<64x16xi8>
    %3 = arith.cmpi ne, %1, %2 : vector<64x16xi8>
    %cst = arith.constant 0xFF800000 : f32
    %4 = vector.broadcast %cst : f32 to vector<64x16xf32>
    %5 = arith.select %3, %0, %4 : vector<64x16xi1>, vector<64x16xf32>
    %cst_3 = arith.constant dense<0xFF800000> : vector<64xf32>
    %6 = vector.multi_reduction <maximumf>, %5, %cst_3 [1] : vector<64x16xf32> to vector<64xf32>
    %7 = vector.shape_cast %6 : vector<64xf32> to vector<64x1xf32>
    %8 = math.absf %7 : vector<64x1xf32>
    %cst_4 = arith.constant 0x7F800000 : f32
    %9 = vector.broadcast %cst_4 : f32 to vector<64x1xf32>
    %10 = arith.cmpf oeq, %8, %9 : vector<64x1xf32>
    %cst_5 = arith.constant 0.000000e+00 : f32
    %11 = vector.broadcast %cst_5 : f32 to vector<64x1xf32>
    %12 = arith.select %10, %11, %7 : vector<64x1xi1>, vector<64x1xf32>
    %13 = vector.broadcast %12 : vector<64x1xf32> to vector<64x16xf32>
    %14 = arith.subf %5, %13 : vector<64x16xf32>
    %15 = math.exp %14 : vector<64x16xf32>
    %cst_6 = arith.constant dense<0.000000e+00> : vector<64xf32>
    %16 = vector.multi_reduction <add>, %15, %cst_6 [1] : vector<64x16xf32> to vector<64xf32>
    %17 = vector.shape_cast %16 : vector<64xf32> to vector<64x1xf32>
    %cst_7 = arith.constant 1.000000e+00 : f32
    %18 = vector.broadcast %cst_7 : f32 to vector<64x1xf32>
    %19 = arith.maximumf %17, %18 : vector<64x1xf32>
    %20 = tpu.reciprocal %19 {approx = true} : vector<64x1xf32> -> vector<64x1xf32>
    %21 = arith.mulf %19, %20 : vector<64x1xf32>
    %cst_8 = arith.constant 2.000000e+00 : f32
    %22 = vector.broadcast %cst_8 : f32 to vector<64x1xf32>
    %23 = arith.subf %22, %21 : vector<64x1xf32>
    %24 = arith.mulf %20, %23 : vector<64x1xf32>
    %25 = vector.broadcast %24 : vector<64x1xf32> to vector<64x16xf32>
    %26 = arith.mulf %15, %25 : vector<64x16xf32>
    %c0_9 = arith.constant 0 : index
    %c0_10 = arith.constant 0 : index
    %27 = vector.load %arg3[%c0_9, %c0_10] : memref<64x16xf32, #tpu.memory_space<vmem>>, vector<64x16xf32>
    tpu.vector_store %arg3[%c0_9, %c0_10], %26 {strides = array<i32>} : memref<64x16xf32, #tpu.memory_space<vmem>>, vector<64x16xf32>,
    return
  }
  func.func @transform_0(%arg0: i32) -> (i32, i32) {
    %c0_i32 = arith.constant 0 : i32
    %c0_i32_0 = arith.constant 0 : i32
    return %arg0, %c0_i32 : i32, i32
  }
  func.func @transform_1(%arg0: i32) -> (i32, i32) {
    %c0_i32 = arith.constant 0 : i32
    %c0_i32_0 = arith.constant 0 : i32
    return %arg0, %c0_i32 : i32, i32
  }
  func.func @transform_2(%arg0: i32) -> (i32, i32) {
    %c0_i32 = arith.constant 0 : i32
    %c0_i32_0 = arith.constant 0 : i32
    return %arg0, %c0_i32 : i32, i32
  }
}

</mosaic_0001>

<bundles_post_ra>
// kernel: tpu_custom_call.1
= control target key start
LH: loop header
LB: loop body
LE: loop exit
PB: predicated region body
PF: predicated region fallthrough
CT: control target
= control target key end

     0   :  { %s498_s9 = smov 0   ;;  %s595_s0 = inlined_call_operand.vmem [shape: f32[128,16], index: 0, kind: input, shape index: {}]   ;;  %s596_s1 = inlined_call_operand.vmem [shape: s32[128,16], index: 1, kind: input, shape index: {}]   ;;  %s597_s2 = inlined_call_operand.vmem [shape: f32[128,16], index: 2, kind: output, shape index: {}]  }
   0x1 LB: > { %s422_s10 = sadd.s32 4294967295, %s481_s9   ;;  %p426_p0 = scmp.ge.s32.totalorder %s481_s9, 1  ;;  %s481_s9 = sphi %s498_s9, %s12_s9  }
   0x2   : > { %p124_p1 = scmp.lt.s32.totalorder %s481_s9, 3 }
   0x4   : > { %p125_p2 = pnand %p426_p0, %p124_p1 }
   0x5   : > { %s427_s11 = sshll.u32 (!%p125_p2), %s422_s10, 3  ;;  %vm201_vm0 = vcmask (!%p125_p2), 130048  }
   0x6   : > { %128 = sbr.rel (%p125_p2) target bundleno = 363 (0x16b), region = 28  ;;  %p152_p3 = scmp.lt.s32.totalorder (!%p125_p2), %s427_s11, 15 }
   0xd   : > { %s599_s11 = smov (!%p152_p3, %s427_s11), 15 }
   0xe   : > { %s506_s12 = sshll.u32 %s599_s11, 3 }
   0xf   : > { %s512_s15 = scalar_lea.vmem %s595_s0, %s506_s12  ;;  %s161_s18 = scalar_lea.vmem %s596_s1, %s506_s12 }
  0x10   : > { %v169_v0 = vld [vmem:[%s512_s15] sm:$0xff]  ;;  %v171_v2 = vld [vmem:[%s512_s15 + $0x10] sm:$0xff]  ;;  %v170_v4 = vld [vmem:[%s512_s15 + $0x8] sm:$0xff]  ;;  %s567_s21 = scalar_lea.vmem %s597_s2, %s506_s12 }
  0x11   : > { %v177_v1 = vld [vmem:[%s161_s18] sm:$0xff]  ;;  %v179_v3 = vld [vmem:[%s161_s18 + $0x10] sm:$0xff]  ;;  %v178_v5 = vld [vmem:[%s161_s18 + $0x8] sm:$0xff] }
  0x12   : > { %vm185_vm1 = vcmp.ne.s32.totalorder %v177_v1, 0  ;;  %vm187_vm2 = vcmp.ne.s32.totalorder %v179_v3, 0  ;;  %vm186_vm3 = vcmp.ne.s32.totalorder %v178_v5, 0  ;;  %v172_v7 = vld [vmem:[%s512_s15 + $0x18] sm:$0xff]  ;;  %v173_v12 = vld [vmem:[%s512_s15 + $0x20] sm:$0xff]  ;;  %v174_v16 = vld [vmem:[%s512_s15 + $0x28] sm:$0xff] }
  0x13   : > { %v193_v6 = vsel %vm185_vm1, %v169_v0, -inf  ;;  %v180_v8 = vld [vmem:[%s161_s18 + $0x18] sm:$0xff]  ;;  %v195_v10 = vsel %vm187_vm2, %v171_v2, -inf  ;;  %v194_v11 = vsel %vm186_vm3, %v170_v4, -inf  ;;  %v181_v13 = vld [vmem:[%s161_s18 + $0x20] sm:$0xff]  ;;  %v182_v17 = vld [vmem:[%s161_s18 + $0x28] sm:$0xff] }
  0x14   : > { %v202_v9 = vsel %vm201_vm0, %v193_v6, -inf  ;;  %vm188_vm4 = vcmp.ne.s32.totalorder %v180_v8, 0  ;;  %v208_v14 = vsel %vm201_vm0, %v195_v10, -inf  ;;  %vm189_vm5 = vcmp.ne.s32.totalorder %v181_v13, 0  ;;  %v183_v19 = vld [vmem:[%s161_s18 + $0x30] sm:$0xff]  ;;  %v184_v20 = vld [vmem:[%s161_s18 + $0x38] sm:$0xff] }
  0x15   : > { %203 = vmax.xlane.f32.xlu0 %v202_v9  ;;  %v196_v15 = vsel %vm188_vm4, %v172_v7, -inf  ;;  %209 = vmax.xlane.f32.xlu1 %v208_v14  ;;  %v205_v18 = vsel %vm201_vm0, %v194_v11, -inf  ;;  %vm190_vm6 = vcmp.ne.s32.totalorder %v182_v17, 0  ;;  %v197_v22 = vsel %vm189_vm5, %v173_v12, -inf  ;;  %v175_v24 = vld [vmem:[%s512_s15 + $0x30] sm:$0xff]  ;;  %v176_v25 = vld [vmem:[%s512_s15 + $0x38] sm:$0xff] }
  0x16   : > { %v211_v21 = vsel %vm201_vm0, %v196_v15, -inf  ;;  %v198_v23 = vsel %vm190_vm6, %v174_v16, -inf  ;;  %vm191_vm7 = vcmp.ne.s32.totalorder %v183_v19, 0  ;;  %vm192_vm8 = vcmp.ne.s32.totalorder %v184_v20, 0 }
  0x17   : > { %v214_v26 = vsel %vm201_vm0, %v197_v22, -inf  ;;  %v217_v27 = vsel %vm201_vm0, %v198_v23, -inf  ;;  %v199_v28 = vsel %vm191_vm7, %v175_v24, -inf  ;;  %v200_v29 = vsel %vm192_vm8, %v176_v25, -inf }
  0x18   : > { %v220_v30 = vsel %vm201_vm0, %v199_v28, -inf  ;;  %v223_v31 = vsel %vm201_vm0, %v200_v29, -inf }
  0x19   : > { %206 = vmax.xlane.f32.xlu0 %v205_v18  ;;  %212 = vmax.xlane.f32.xlu1 %v211_v21 }
  0x1d   : > { %215 = vmax.xlane.f32.xlu0 %v214_v26  ;;  %218 = vmax.xlane.f32.xlu1 %v217_v27 }
  0x21   : > { %221 = vmax.xlane.f32.xlu0 %v220_v30  ;;  %224 = vmax.xlane.f32.xlu1 %v223_v31 }
  0xa2   : > { %v204_v32 = vpop.xlane.xlu0 %203  ;;  %v210_v34 = vpop.xlane.xlu1 %209 }
  0xa3   : > { %v226_v33 = vand.u32 2147483647, %v204_v32  ;;  %v228_v35 = vand.u32 2147483647, %v210_v34 }
  0xa5   : > { %vm234_vm9 = vcmp.eq.f32.partialorder %v226_v33, inf  ;;  %vm236_vm10 = vcmp.eq.f32.partialorder %v228_v35, inf }
  0xa6   : > { %v242_v36 = vsel %vm234_vm9, 0.0, %v204_v32  ;;  %v207_v37 = vpop.xlane.xlu0 %206  ;;  %v244_v39 = vsel %vm236_vm10, 0.0, %v210_v34  ;;  %v213_v41 = vpop.xlane.xlu1 %212 }
  0xa7   : > { %v250_v38 = vsub.f32 %v193_v6, %v242_v36  ;;  %v227_v40 = vand.u32 2147483647, %v207_v37  ;;  %v252_v42 = vsub.f32 %v195_v10, %v244_v39  ;;  %v229_v43 = vand.u32 2147483647, %v213_v41 }
  0xa9   : > { %v258_v44 = vmul.f32 1.442695, %v250_v38  ;;  %vm235_vm11 = vcmp.eq.f32.partialorder %v227_v40, inf  ;;  %v262_v45 = vmul.f32 1.442695, %v252_v42  ;;  %vm237_vm12 = vcmp.eq.f32.partialorder %v229_v43, inf }
  0xaa   : > { %v243_v46 = vsel %vm235_vm11, 0.0, %v207_v37  ;;  %v216_v47 = vpop.xlane.xlu0 %215  ;;  %v245_v49 = vsel %vm237_vm12, 0.0, %v213_v41  ;;  %v219_v51 = vpop.xlane.xlu1 %218 }
  0xab   : > { %443 = vpow2.f32 %v258_v44  ;;  %v251_v48 = vsub.f32 %v194_v11, %v243_v46  ;;  %v230_v50 = vand.u32 2147483647, %v216_v47  ;;  %v253_v52 = vsub.f32 %v196_v15, %v245_v49 }
  0xac   : > { %v231_v53 = vand.u32 2147483647, %v219_v51  ;;  %445 = vpow2.f32 %v262_v45 }
  0xad   : > { %v260_v54 = vmul.f32 1.442695, %v251_v48  ;;  %vm238_vm13 = vcmp.eq.f32.partialorder %v230_v50, inf  ;;  %v264_v55 = vmul.f32 1.442695, %v253_v52 }
  0xae   : > { %v246_v56 = vsel %vm238_vm13, 0.0, %v216_v47  ;;  %vm239_vm14 = vcmp.eq.f32.partialorder %v231_v53, inf  ;;  %v222_v57 = vpop.xlane.xlu0 %221  ;;  %v225_v61 = vpop.xlane.xlu1 %224 }
  0xaf   : > { %447 = vpow2.f32 %v260_v54  ;;  %v254_v58 = vsub.f32 %v197_v22, %v246_v56  ;;  %v247_v59 = vsel %vm239_vm14, 0.0, %v219_v51  ;;  %v232_v60 = vand.u32 2147483647, %v222_v57 }
  0xb0   : > { %v255_v62 = vsub.f32 %v198_v23, %v247_v59  ;;  %v233_v63 = vand.u32 2147483647, %v225_v61  ;;  %449 = vpow2.f32 %v264_v55 }
  0xb1   : > { %v266_v0 = vmul.f32 1.442695, %v254_v58  ;;  %vm240_vm15 = vcmp.eq.f32.partialorder %v232_v60, inf }
  0xb2   : > { %v268_v1 = vmul.f32 1.442695, %v255_v62  ;;  %v248_v2 = vsel %vm240_vm15, 0.0, %v222_v57  ;;  %vm241_vm1 = vcmp.eq.f32.partialorder %v233_v63, inf }
  0xb3   : > { %451 = vpow2.f32 %v266_v0  ;;  %v256_v3 = vsub.f32 %v199_v28, %v248_v2  ;;  %v249_v4 = vsel %vm241_vm1, 0.0, %v225_v61 }
  0xb4   : > { %v257_v5 = vsub.f32 %v200_v29, %v249_v4  ;;  %453 = vpow2.f32 %v268_v1 }
  0xb5   : > { %v444_v6 = vpop.eup %443  ;;  %v270_v7 = vmul.f32 1.442695, %v256_v3 }
  0xb6   : > { %v272_v8 = vmul.f32 1.442695, %v257_v5  ;;  %v274_v9 = vsel %vm201_vm0, %v444_v6, 0.0  ;;  %v535_v10 = vpop.eup %445 }
  0xb7   : > { %455 = vpow2.f32 %v270_v7  ;;  %275 = vadd.xlane.f32.xlu0 %v274_v9  ;;  %v280_v12 = vsel %vm201_vm0, %v535_v10, 0.0 }
  0xb8   : > { %457 = vpow2.f32 %v272_v8 }
  0xb9   : > { %v537_v11 = vpop.eup %447 }
  0xba   : > { %v277_v13 = vsel %vm201_vm0, %v537_v11, 0.0  ;;  %v543_v14 = vpop.eup %449 }
  0xbb   : > { %281 = vadd.xlane.f32.xlu0 %v280_v12  ;;  %278 = vadd.xlane.f32.xlu1 %v277_v13  ;;  %v283_v16 = vsel %vm201_vm0, %v543_v14, 0.0 }
  0xbd   : > { %v545_v15 = vpop.eup %451 }
  0xbe   : > { %v286_v17 = vsel %vm201_vm0, %v545_v15, 0.0  ;;  %v551_v18 = vpop.eup %453 }
  0xbf   : > { %284 = vadd.xlane.f32.xlu1 %v283_v16  ;;  %287 = vadd.xlane.f32.xlu0 %v286_v17  ;;  %v289_v20 = vsel %vm201_vm0, %v551_v18, 0.0 }
  0xc1   : > { %v553_v19 = vpop.eup %455 }
  0xc2   : > { %v292_v21 = vsel %vm201_vm0, %v553_v19, 0.0  ;;  %v559_v22 = vpop.eup %457 }
  0xc3   : > { %290 = vadd.xlane.f32.xlu1 %v289_v20  ;;  %293 = vadd.xlane.f32.xlu0 %v292_v21  ;;  %v295_v23 = vsel %vm201_vm0, %v559_v22, 0.0 }
  0xc7   : > { %296 = vadd.xlane.f32.xlu1 %v295_v23 }
 0x144   : > { %v276_v24 = vpop.xlane.xlu0 %275 }
 0x145   : > { %v298_v25 = vmax.f32 %v276_v24, 1.0 }
 0x147   : > { %459 = vrcp.f32 %v298_v25 }
 0x148   : > { %v279_v26 = vpop.xlane.xlu1 %278  ;;  %v282_v27 = vpop.xlane.xlu0 %281 }
 0x149   : > { %v299_v28 = vmax.f32 %v279_v26, 1.0  ;;  %v300_v29 = vmax.f32 %v282_v27, 1.0 }
 0x14b   : > { %461 = vrcp.f32 %v299_v28 }
 0x14c   : > { %463 = vrcp.f32 %v300_v29  ;;  %v285_v30 = vpop.xlane.xlu1 %284  ;;  %v288_v31 = vpop.xlane.xlu0 %287 }
 0x14d   : > { %v301_v32 = vmax.f32 %v285_v30, 1.0  ;;  %v302_v33 = vmax.f32 %v288_v31, 1.0 }
 0x14f   : > { %465 = vrcp.f32 %v301_v32 }
 0x150   : > { %467 = vrcp.f32 %v302_v33  ;;  %v291_v34 = vpop.xlane.xlu1 %290  ;;  %v294_v35 = vpop.xlane.xlu0 %293 }
 0x151   : > { %v460_v36 = vpop.eup %459  ;;  %v303_v37 = vmax.f32 %v291_v34, 1.0  ;;  %v304_v38 = vmax.f32 %v294_v35, 1.0 }
 0x152   : > { %v314_v39 = vmul.f32 %v460_v36, %v298_v25 }
 0x153   : > { %469 = vrcp.f32 %v303_v37 }
 0x154   : > { %v322_v40 = vsub.f32 2.0, %v314_v39  ;;  %471 = vrcp.f32 %v304_v38  ;;  %v297_v41 = vpop.xlane.xlu1 %296 }
 0x155   : > { %v462_v42 = vpop.eup %461  ;;  %v305_v43 = vmax.f32 %v297_v41, 1.0 }
 0x156   : > { %v464_v44 = vpop.eup %463  ;;  %v330_v45 = vmul.f32 %v460_v36, %v322_v40  ;;  %v315_v46 = vmul.f32 %v462_v42, %v299_v28 }
 0x157   : > { %v316_v47 = vmul.f32 %v464_v44, %v300_v29  ;;  %473 = vrcp.f32 %v305_v43 }
 0x158   : > { %v338_v48 = vmul.f32 %v444_v6, %v330_v45  ;;  %v323_v49 = vsub.f32 2.0, %v315_v46 }
 0x159   : > { %v466_v50 = vpop.eup %465  ;;  %v324_v51 = vsub.f32 2.0, %v316_v47 }
 0x15a   : > { %v468_v52 = vpop.eup %467  ;;  %346 = vst.msk [vmem:[%s567_s21] sm:$0xff] %vm201_vm0, %v338_v48  ;;  %v331_v53 = vmul.f32 %v462_v42, %v323_v49  ;;  %v317_v54 = vmul.f32 %v466_v50, %v301_v32 }
 0x15b   : > { %v332_v55 = vmul.f32 %v464_v44, %v324_v51  ;;  %v318_v56 = vmul.f32 %v468_v52, %v302_v33 }
 0x15c   : > { %v339_v57 = vmul.f32 %v537_v11, %v331_v53  ;;  %v325_v58 = vsub.f32 2.0, %v317_v54 }
 0x15d   : > { %v470_v59 = vpop.eup %469  ;;  %v340_v60 = vmul.f32 %v535_v10, %v332_v55  ;;  %v326_v61 = vsub.f32 2.0, %v318_v56 }
 0x15e   : > { %v472_v62 = vpop.eup %471  ;;  %347 = vst.msk [vmem:[%s567_s21 + $0x8] sm:$0xff] %vm201_vm0, %v339_v57  ;;  %v333_v63 = vmul.f32 %v466_v50, %v325_v58  ;;  %v319_v0 = vmul.f32 %v470_v59, %v303_v37 }
 0x15f   : > { %348 = vst.msk [vmem:[%s567_s21 + $0x10] sm:$0xff] %vm201_vm0, %v340_v60  ;;  %v334_v1 = vmul.f32 %v468_v52, %v326_v61  ;;  %v320_v2 = vmul.f32 %v472_v62, %v304_v38 }
 0x160   : > { %v341_v3 = vmul.f32 %v543_v14, %v333_v63  ;;  %v327_v4 = vsub.f32 2.0, %v319_v0 }
 0x161   : > { %v474_v5 = vpop.eup %473  ;;  %v342_v6 = vmul.f32 %v545_v15, %v334_v1  ;;  %v328_v7 = vsub.f32 2.0, %v320_v2 }
 0x162   : > { %349 = vst.msk [vmem:[%s567_s21 + $0x18] sm:$0xff] %vm201_vm0, %v341_v3  ;;  %v335_v8 = vmul.f32 %v470_v59, %v327_v4  ;;  %v321_v9 = vmul.f32 %v474_v5, %v305_v43 }
 0x163   : > { %350 = vst.msk [vmem:[%s567_s21 + $0x20] sm:$0xff] %vm201_vm0, %v342_v6  ;;  %v336_v10 = vmul.f32 %v472_v62, %v328_v7 }
 0x164   : > { %v343_v11 = vmul.f32 %v551_v18, %v335_v8  ;;  %v329_v12 = vsub.f32 2.0, %v321_v9 }
 0x165   : > { %v344_v13 = vmul.f32 %v553_v19, %v336_v10 }
 0x166   : > { %351 = vst.msk [vmem:[%s567_s21 + $0x28] sm:$0xff] %vm201_vm0, %v343_v11  ;;  %v337_v14 = vmul.f32 %v474_v5, %v329_v12 }
 0x167   : > { %352 = vst.msk [vmem:[%s567_s21 + $0x30] sm:$0xff] %vm201_vm0, %v344_v13 }
 0x168   : > { %v345_v15 = vmul.f32 %v559_v22, %v337_v14 }
 0x16a   : > { %353 = vst.msk [vmem:[%s567_s21 + $0x38] sm:$0xff] %vm201_vm0, %v345_v15 }
 0x16b PF: > { %s12_s9 = sadd.s32 1, %s481_s9  }
 0x16c   : > { %p9_p4 = scmp.ge.s32.totalorder %s12_s9, 4  }
 0x16e   :  { %11 = sbr.rel (!%p9_p4) target bundleno = 1 (0x1), region = 61 }

// kernel: tpu_custom_call.1
= control target key start
LH: loop header
LB: loop body
LE: loop exit
PB: predicated region body
PF: predicated region fallthrough
CT: control target
= control target key end

     0   :  { %s548_s9 = smov 0   ;;  %s661_s0 = inlined_call_operand.vmem [shape: f32[128,16], index: 0, kind: input, shape index: {}]   ;;  %s662_s1 = inlined_call_operand.vmem [shape: s8[128,16], index: 1, kind: input, shape index: {}]   ;;  %s663_s2 = inlined_call_operand.vmem [shape: f32[128,16], index: 2, kind: output, shape index: {}]  }
   0x1 LB: > { %s470_s10 = sadd.s32 4294967295, %s530_s9   ;;  %p474_p0 = scmp.ge.s32.totalorder %s530_s9, 1  ;;  %s530_s9 = sphi %s548_s9, %s12_s9  }
   0x2   : > { %p124_p1 = scmp.lt.s32.totalorder %s530_s9, 3 }
   0x4   : > { %p125_p2 = pnand %p474_p0, %p124_p1 }
   0x5   : > { %s477_s11 = sshll.u32 (!%p125_p2), %s470_s10, 1  ;;  %s475_s12 = sshll.u32 (!%p125_p2), %s470_s10, 3  ;;  %v532_v2 = vmov (!%p125_p2), 0   ;;  %vm249_vm2 = vcmask (!%p125_p2), 130048  }
   0x6   : > { %128 = sbr.rel (%p125_p2) target bundleno = 374 (0x176), region = 28  ;;  %p158_p3 = scmp.lt.s32.totalorder (!%p125_p2), %s477_s11, 3 }
   0x7   : > { %p152_p4 = scmp.lt.s32.totalorder (!%p125_p2), %s475_s12, 15 }
   0xd   : > { %s665_s11 = smov (!%p158_p3, %s477_s11), 3  ;;  %s667_s12 = smov (!%p152_p4, %s475_s12), 15 }
   0xe   : > { %s478_s13 = sshll.u32 %s665_s11, 3  ;;  %s476_s17 = sshll.u32 %s667_s12, 3 }
   0xf   : > { %s161_s16 = scalar_lea.vmem %s662_s1, %s478_s13  ;;  %s569_s20 = scalar_lea.vmem %s661_s0, %s476_s17 }
  0x10   : > { %v179_v0 = vld [vmem:[%s161_s16] sm:$0xff]  ;;  %v180_v1 = vld [vmem:[%s161_s16 + $0x8] sm:$0xff]  ;;  %v173_v31 = vld [vmem:[%s569_s20 + $0x10] sm:$0xff]  ;;  %s633_s23 = scalar_lea.vmem %s663_s2, %s476_s17 }
  0x11   : > { %vm181_vm0 = vnez %v179_v0  ;;  %vm182_vm1 = vnez %v180_v1  ;;  %v171_v29 = vld [vmem:[%s569_s20] sm:$0xff]  ;;  %v172_v33 = vld [vmem:[%s569_s20 + $0x8] sm:$0xff]  ;;  %v174_v36 = vld [vmem:[%s569_s20 + $0x18] sm:$0xff] }
  0x12   : > { %v183_v3 = vsel %vm181_vm0, 16843009, %v532_v2  ;;  %v184_v8 = vsel %vm182_vm1, 16843009, %v532_v2  ;;  %v175_v48 = vld [vmem:[%s569_s20 + $0x20] sm:$0xff]  ;;  %v176_v54 = vld [vmem:[%s569_s20 + $0x28] sm:$0xff] }
  0x13   : > { %v185_v4 = vunpack.c.0.s8 %v183_v3  ;;  %v187_v5 = vunpack.c.2.s8 %v183_v3  ;;  %v186_v6 = vunpack.c.1.s8 %v183_v3  ;;  %v188_v7 = vunpack.c.3.s8 %v183_v3  ;;  %v177_v58 = vld [vmem:[%s569_s20 + $0x30] sm:$0xff]  ;;  %v178_v62 = vld [vmem:[%s569_s20 + $0x38] sm:$0xff] }
  0x14   : > { %v189_v13 = vunpack.c.0.s8 %v184_v8  ;;  %v190_v14 = vunpack.c.1.s8 %v184_v8  ;;  %v191_v15 = vunpack.c.2.s8 %v184_v8  ;;  %v192_v16 = vunpack.c.3.s8 %v184_v8 }
  0x15   : > { %v193_v9 = vpack.c.b16 %v185_v4, %v185_v4  ;;  %v197_v10 = vpack.c.b16 %v187_v5, %v187_v5  ;;  %v195_v11 = vpack.c.b16 %v186_v6, %v186_v6  ;;  %v199_v12 = vpack.c.b16 %v188_v7, %v188_v7 }
  0x16   : > { %v201_v21 = vpack.c.b16 %v189_v13, %v189_v13  ;;  %v203_v22 = vpack.c.b16 %v190_v14, %v190_v14  ;;  %v205_v23 = vpack.c.b16 %v191_v15, %v191_v15  ;;  %v207_v24 = vpack.c.b16 %v192_v16, %v192_v16 }
  0x17   : > { %v194_v17 = vpack.c.b8 %v193_v9, %v193_v9  ;;  %v198_v18 = vpack.c.b8 %v197_v10, %v197_v10  ;;  %v196_v19 = vpack.c.b8 %v195_v11, %v195_v11  ;;  %v200_v20 = vpack.c.b8 %v199_v12, %v199_v12 }
  0x18   : > { %v202_v28 = vpack.c.b8 %v201_v21, %v201_v21  ;;  %v204_v38 = vpack.c.b8 %v203_v22, %v203_v22  ;;  %v206_v39 = vpack.c.b8 %v205_v23, %v205_v23  ;;  %v208_v53 = vpack.c.b8 %v207_v24, %v207_v24 }
  0x19   : > { %vm209_vm3 = vnez %v194_v17  ;;  %vm211_vm4 = vnez %v198_v18  ;;  %vm210_vm5 = vnez %v196_v19  ;;  %vm212_vm6 = vnez %v200_v20 }
  0x1a   : > { %v217_v25 = vsel %vm209_vm3, 16843009, %v532_v2  ;;  %v219_v26 = vsel %vm211_vm4, 16843009, %v532_v2  ;;  %v218_v27 = vsel %vm210_vm5, 16843009, %v532_v2  ;;  %vm213_vm7 = vnez %v202_v28 }
  0x1b   : > { %v225_v30 = vunpack.c.0.s8 %v217_v25  ;;  %v227_v32 = vunpack.c.0.s8 %v219_v26  ;;  %v226_v34 = vunpack.c.0.s8 %v218_v27  ;;  %v220_v35 = vsel %vm212_vm6, 16843009, %v532_v2 }
  0x1c   : > { %v228_v37 = vunpack.c.0.s8 %v220_v35  ;;  %v221_v40 = vsel %vm213_vm7, 16843009, %v532_v2  ;;  %vm214_vm12 = vnez %v204_v38  ;;  %vm215_vm13 = vnez %v206_v39 }
  0x1d   : > { %vm233_vm8 = vcmp.ne.s32.totalorder %v225_v30, 0  ;;  %vm235_vm9 = vcmp.ne.s32.totalorder %v227_v32, 0  ;;  %vm234_vm10 = vcmp.ne.s32.totalorder %v226_v34, 0  ;;  %v229_v49 = vunpack.c.0.s8 %v221_v40 }
  0x1e   : > { %v241_v41 = vsel %vm233_vm8, %v171_v29, -inf  ;;  %v243_v42 = vsel %vm235_vm9, %v173_v31, -inf  ;;  %v580_v43 = vsel %vm234_vm10, %v172_v33, -inf  ;;  %vm236_vm11 = vcmp.ne.s32.totalorder %v228_v37, 0 }
  0x1f   : > { %v250_v44 = vsel %vm249_vm2, %v241_v41, -inf  ;;  %v256_v45 = vsel %vm249_vm2, %v243_v42, -inf  ;;  %v244_v46 = vsel %vm236_vm11, %v174_v36, -inf  ;;  %v253_v47 = vsel %vm249_vm2, %v580_v43, -inf }
  0x20   : > { %251 = vmax.xlane.f32.xlu0 %v250_v44  ;;  %257 = vmax.xlane.f32.xlu1 %v256_v45  ;;  %v259_v50 = vsel %vm249_vm2, %v244_v46, -inf  ;;  %v222_v51 = vsel %vm214_vm12, 16843009, %v532_v2  ;;  %v223_v52 = vsel %vm215_vm13, 16843009, %v532_v2  ;;  %vm237_vm14 = vcmp.ne.s32.totalorder %v229_v49, 0 }
  0x21   : > { %v230_v55 = vunpack.c.0.s8 %v222_v51  ;;  %v231_v56 = vunpack.c.0.s8 %v223_v52  ;;  %v245_v57 = vsel %vm237_vm14, %v175_v48, -inf  ;;  %vm216_vm15 = vnez %v208_v53 }
  0x22   : > { %v224_v59 = vsel %vm216_vm15, 16843009, %v532_v2  ;;  %v262_v60 = vsel %vm249_vm2, %v245_v57, -inf }
  0x23   : > { %vm238_vm0 = vcmp.ne.s32.totalorder %v230_v55, 0  ;;  %vm239_vm1 = vcmp.ne.s32.totalorder %v231_v56, 0  ;;  %v232_v63 = vunpack.c.0.s8 %v224_v59 }
  0x24   : > { %254 = vmax.xlane.f32.xlu0 %v253_v47  ;;  %260 = vmax.xlane.f32.xlu1 %v259_v50  ;;  %v246_v61 = vsel %vm238_vm0, %v176_v54, -inf  ;;  %v247_v1 = vsel %vm239_vm1, %v177_v58, -inf }
  0x25   : > { %v265_v0 = vsel %vm249_vm2, %v246_v61, -inf  ;;  %vm240_vm3 = vcmp.ne.s32.totalorder %v232_v63, 0  ;;  %v268_v4 = vsel %vm249_vm2, %v247_v1, -inf }
  0x26   : > { %v248_v3 = vsel %vm240_vm3, %v178_v62, -inf }
  0x27   : > { %v271_v5 = vsel %vm249_vm2, %v248_v3, -inf }
  0x28   : > { %263 = vmax.xlane.f32.xlu0 %v262_v60  ;;  %266 = vmax.xlane.f32.xlu1 %v265_v0 }
  0x2c   : > { %269 = vmax.xlane.f32.xlu0 %v268_v4  ;;  %272 = vmax.xlane.f32.xlu1 %v271_v5 }
  0xad   : > { %v252_v6 = vpop.xlane.xlu0 %251  ;;  %v258_v2 = vpop.xlane.xlu1 %257 }
  0xae   : > { %v274_v7 = vand.u32 2147483647, %v252_v6  ;;  %v276_v8 = vand.u32 2147483647, %v258_v2 }
  0xb0   : > { %vm282_vm4 = vcmp.eq.f32.partialorder %v274_v7, inf  ;;  %vm284_vm5 = vcmp.eq.f32.partialorder %v276_v8, inf }
  0xb1   : > { %v290_v9 = vsel %vm282_vm4, 0.0, %v252_v6  ;;  %v292_v10 = vsel %vm284_vm5, 0.0, %v258_v2  ;;  %v255_v11 = vpop.xlane.xlu0 %254  ;;  %v261_v12 = vpop.xlane.xlu1 %260 }
  0xb2   : > { %v298_v13 = vsub.f32 %v241_v41, %v290_v9  ;;  %v300_v14 = vsub.f32 %v243_v42, %v292_v10  ;;  %v275_v15 = vand.u32 2147483647, %v255_v11  ;;  %v277_v16 = vand.u32 2147483647, %v261_v12 }
  0xb4   : > { %v306_v17 = vmul.f32 1.442695, %v298_v13  ;;  %v310_v18 = vmul.f32 1.442695, %v300_v14  ;;  %vm283_vm6 = vcmp.eq.f32.partialorder %v275_v15, inf  ;;  %vm285_vm7 = vcmp.eq.f32.partialorder %v277_v16, inf }
  0xb5   : > { %v291_v19 = vsel %vm283_vm6, 0.0, %v255_v11  ;;  %v293_v20 = vsel %vm285_vm7, 0.0, %v261_v12  ;;  %v264_v21 = vpop.xlane.xlu0 %263  ;;  %v267_v22 = vpop.xlane.xlu1 %266 }
  0xb6   : > { %492 = vpow2.f32 %v306_v17  ;;  %v299_v23 = vsub.f32 %v580_v43, %v291_v19  ;;  %v301_v24 = vsub.f32 %v244_v46, %v293_v20  ;;  %v278_v25 = vand.u32 2147483647, %v264_v21 }
  0xb7   : > { %v279_v26 = vand.u32 2147483647, %v267_v22  ;;  %494 = vpow2.f32 %v310_v18 }
  0xb8   : > { %v308_v27 = vmul.f32 1.442695, %v299_v23  ;;  %v312_v28 = vmul.f32 1.442695, %v301_v24  ;;  %vm286_vm8 = vcmp.eq.f32.partialorder %v278_v25, inf }
  0xb9   : > { %v294_v29 = vsel %vm286_vm8, 0.0, %v264_v21  ;;  %vm287_vm9 = vcmp.eq.f32.partialorder %v279_v26, inf  ;;  %v270_v30 = vpop.xlane.xlu0 %269  ;;  %v273_v31 = vpop.xlane.xlu1 %272 }
  0xba   : > { %496 = vpow2.f32 %v308_v27  ;;  %v302_v32 = vsub.f32 %v245_v57, %v294_v29  ;;  %v295_v33 = vsel %vm287_vm9, 0.0, %v267_v22  ;;  %v280_v34 = vand.u32 2147483647, %v270_v30 }
  0xbb   : > { %v303_v35 = vsub.f32 %v246_v61, %v295_v33  ;;  %v281_v36 = vand.u32 2147483647, %v273_v31  ;;  %498 = vpow2.f32 %v312_v28 }
  0xbc   : > { %v314_v37 = vmul.f32 1.442695, %v302_v32  ;;  %vm288_vm10 = vcmp.eq.f32.partialorder %v280_v34, inf }
  0xbd   : > { %v316_v38 = vmul.f32 1.442695, %v303_v35  ;;  %v296_v39 = vsel %vm288_vm10, 0.0, %v270_v30  ;;  %vm289_vm11 = vcmp.eq.f32.partialorder %v281_v36, inf }
  0xbe   : > { %500 = vpow2.f32 %v314_v37  ;;  %v304_v40 = vsub.f32 %v247_v1, %v296_v39  ;;  %v297_v41 = vsel %vm289_vm11, 0.0, %v273_v31 }
  0xbf   : > { %v305_v42 = vsub.f32 %v248_v3, %v297_v41  ;;  %502 = vpow2.f32 %v316_v38 }
  0xc0   : > { %v493_v43 = vpop.eup %492  ;;  %v318_v44 = vmul.f32 1.442695, %v304_v40 }
  0xc1   : > { %v320_v45 = vmul.f32 1.442695, %v305_v42  ;;  %v322_v46 = vsel %vm249_vm2, %v493_v43, 0.0  ;;  %v600_v47 = vpop.eup %494 }
  0xc2   : > { %504 = vpow2.f32 %v318_v44  ;;  %323 = vadd.xlane.f32.xlu0 %v322_v46  ;;  %v328_v49 = vsel %vm249_vm2, %v600_v47, 0.0 }
  0xc3   : > { %506 = vpow2.f32 %v320_v45 }
  0xc4   : > { %v602_v48 = vpop.eup %496 }
  0xc5   : > { %v325_v50 = vsel %vm249_vm2, %v602_v48, 0.0  ;;  %v608_v51 = vpop.eup %498 }
  0xc6   : > { %329 = vadd.xlane.f32.xlu0 %v328_v49  ;;  %326 = vadd.xlane.f32.xlu1 %v325_v50  ;;  %v331_v53 = vsel %vm249_vm2, %v608_v51, 0.0 }
  0xc8   : > { %v610_v52 = vpop.eup %500 }
  0xc9   : > { %v334_v54 = vsel %vm249_vm2, %v610_v52, 0.0  ;;  %v616_v55 = vpop.eup %502 }
  0xca   : > { %332 = vadd.xlane.f32.xlu1 %v331_v53  ;;  %335 = vadd.xlane.f32.xlu0 %v334_v54  ;;  %v337_v57 = vsel %vm249_vm2, %v616_v55, 0.0 }
  0xcc   : > { %v618_v56 = vpop.eup %504 }
  0xcd   : > { %v340_v58 = vsel %vm249_vm2, %v618_v56, 0.0  ;;  %v624_v59 = vpop.eup %506 }
  0xce   : > { %338 = vadd.xlane.f32.xlu1 %v337_v57  ;;  %341 = vadd.xlane.f32.xlu0 %v340_v58  ;;  %v343_v60 = vsel %vm249_vm2, %v624_v59, 0.0 }
  0xd2   : > { %344 = vadd.xlane.f32.xlu1 %v343_v60 }
 0x14f   : > { %v324_v61 = vpop.xlane.xlu0 %323 }
 0x150   : > { %v346_v62 = vmax.f32 %v324_v61, 1.0 }
 0x152   : > { %508 = vrcp.f32 %v346_v62 }
 0x153   : > { %v327_v63 = vpop.xlane.xlu1 %326  ;;  %v330_v0 = vpop.xlane.xlu0 %329 }
 0x154   : > { %v347_v1 = vmax.f32 %v327_v63, 1.0  ;;  %v348_v3 = vmax.f32 %v330_v0, 1.0 }
 0x156   : > { %510 = vrcp.f32 %v347_v1 }
 0x157   : > { %512 = vrcp.f32 %v348_v3  ;;  %v333_v4 = vpop.xlane.xlu1 %332  ;;  %v336_v5 = vpop.xlane.xlu0 %335 }
 0x158   : > { %v349_v6 = vmax.f32 %v333_v4, 1.0  ;;  %v350_v2 = vmax.f32 %v336_v5, 1.0 }
 0x15a   : > { %514 = vrcp.f32 %v349_v6 }
 0x15b   : > { %516 = vrcp.f32 %v350_v2  ;;  %v339_v7 = vpop.xlane.xlu1 %338  ;;  %v342_v8 = vpop.xlane.xlu0 %341 }
 0x15c   : > { %v509_v9 = vpop.eup %508  ;;  %v351_v10 = vmax.f32 %v339_v7, 1.0  ;;  %v352_v11 = vmax.f32 %v342_v8, 1.0 }
 0x15d   : > { %v362_v12 = vmul.f32 %v509_v9, %v346_v62 }
 0x15e   : > { %518 = vrcp.f32 %v351_v10 }
 0x15f   : > { %v370_v13 = vsub.f32 2.0, %v362_v12  ;;  %520 = vrcp.f32 %v352_v11  ;;  %v345_v14 = vpop.xlane.xlu1 %344 }
 0x160   : > { %v511_v15 = vpop.eup %510  ;;  %v353_v16 = vmax.f32 %v345_v14, 1.0 }
 0x161   : > { %v513_v17 = vpop.eup %512  ;;  %v378_v18 = vmul.f32 %v509_v9, %v370_v13  ;;  %v363_v19 = vmul.f32 %v511_v15, %v347_v1 }
 0x162   : > { %v364_v20 = vmul.f32 %v513_v17, %v348_v3  ;;  %522 = vrcp.f32 %v353_v16 }
 0x163   : > { %v386_v21 = vmul.f32 %v493_v43, %v378_v18  ;;  %v371_v22 = vsub.f32 2.0, %v363_v19 }
 0x164   : > { %v515_v23 = vpop.eup %514  ;;  %v372_v24 = vsub.f32 2.0, %v364_v20 }
 0x165   : > { %v517_v25 = vpop.eup %516  ;;  %394 = vst.msk [vmem:[%s633_s23] sm:$0xff] %vm249_vm2, %v386_v21  ;;  %v379_v26 = vmul.f32 %v511_v15, %v371_v22  ;;  %v365_v27 = vmul.f32 %v515_v23, %v349_v6 }
 0x166   : > { %v380_v28 = vmul.f32 %v513_v17, %v372_v24  ;;  %v366_v29 = vmul.f32 %v517_v25, %v350_v2 }
 0x167   : > { %v387_v30 = vmul.f32 %v602_v48, %v379_v26  ;;  %v373_v31 = vsub.f32 2.0, %v365_v27 }
 0x168   : > { %v519_v32 = vpop.eup %518  ;;  %v388_v33 = vmul.f32 %v600_v47, %v380_v28  ;;  %v374_v34 = vsub.f32 2.0, %v366_v29 }
 0x169   : > { %v521_v35 = vpop.eup %520  ;;  %395 = vst.msk [vmem:[%s633_s23 + $0x8] sm:$0xff] %vm249_vm2, %v387_v30  ;;  %v381_v36 = vmul.f32 %v515_v23, %v373_v31  ;;  %v367_v37 = vmul.f32 %v519_v32, %v351_v10 }
 0x16a   : > { %396 = vst.msk [vmem:[%s633_s23 + $0x10] sm:$0xff] %vm249_vm2, %v388_v33  ;;  %v382_v38 = vmul.f32 %v517_v25, %v374_v34  ;;  %v368_v39 = vmul.f32 %v521_v35, %v352_v11 }
 0x16b   : > { %v389_v40 = vmul.f32 %v608_v51, %v381_v36  ;;  %v375_v41 = vsub.f32 2.0, %v367_v37 }
 0x16c   : > { %v523_v42 = vpop.eup %522  ;;  %v390_v43 = vmul.f32 %v610_v52, %v382_v38  ;;  %v376_v44 = vsub.f32 2.0, %v368_v39 }
 0x16d   : > { %397 = vst.msk [vmem:[%s633_s23 + $0x18] sm:$0xff] %vm249_vm2, %v389_v40  ;;  %v383_v45 = vmul.f32 %v519_v32, %v375_v41  ;;  %v369_v46 = vmul.f32 %v523_v42, %v353_v16 }
 0x16e   : > { %398 = vst.msk [vmem:[%s633_s23 + $0x20] sm:$0xff] %vm249_vm2, %v390_v43  ;;  %v384_v47 = vmul.f32 %v521_v35, %v376_v44 }
 0x16f   : > { %v391_v48 = vmul.f32 %v616_v55, %v383_v45  ;;  %v377_v49 = vsub.f32 2.0, %v369_v46 }
 0x170   : > { %v392_v50 = vmul.f32 %v618_v56, %v384_v47 }
 0x171   : > { %399 = vst.msk [vmem:[%s633_s23 + $0x28] sm:$0xff] %vm249_vm2, %v391_v48  ;;  %v385_v51 = vmul.f32 %v523_v42, %v377_v49 }
 0x172   : > { %400 = vst.msk [vmem:[%s633_s23 + $0x30] sm:$0xff] %vm249_vm2, %v392_v50 }
 0x173   : > { %v393_v52 = vmul.f32 %v624_v59, %v385_v51 }
 0x175   : > { %401 = vst.msk [vmem:[%s633_s23 + $0x38] sm:$0xff] %vm249_vm2, %v393_v52 }
 0x176 PF: > { %s12_s9 = sadd.s32 1, %s530_s9  }
 0x177   : > { %p9_p5 = scmp.ge.s32.totalorder %s12_s9, 4  }
 0x179   :  { %11 = sbr.rel (!%p9_p5) target bundleno = 1 (0x1), region = 61 }

</bundles_post_ra>
